<compile_context>
chip_gen: v7x
topology: tpu7x:2x2x1
jax: 0.10.0
libtpu: 0.0.40
codegen_flags: <defaults>
</compile_context>

<pallas_src>
import functools
import math

import jax
import jax.numpy as jnp
from jax.experimental import pallas as pl
from jax.experimental.pallas import tpu as pltpu

# ---- HKO config constants (cfg.HKO.EVALUATION.*) --------------------------
BALANCING_WEIGHTS = (1.0, 1.0, 2.0, 5.0, 10.0, 30.0)
RAIN_THRESHOLDS = (0.5, 2.0, 5.0, 10.0, 30.0)


def rainfall_to_pixel(rainfall_intensity, a=58.53, b=1.56):
    # dBR -> dBZ -> pixel value in [0, 1]
    dBR = math.log10(rainfall_intensity) * 10.0
    dBZ = dBR * b + 10.0 * math.log10(a)
    return (dBZ + 10.0) / 70.0


PIXEL_THRESHOLDS = tuple(rainfall_to_pixel(t) for t in RAIN_THRESHOLDS)

# Loss hyperparameters (module defaults).
MSE_WEIGHT = 1.0
MAE_WEIGHT = 1.0
NORMAL_LOSS_GLOBAL_SCALE = 5e-05
LAMBDA = None  # default in the module

# Tiling constants.
_LANE = 128
_MAX_TD = 32768                    # lane-tile cap (balanced split below)
_VMEM_LIMIT = 48 * 1024 * 1024     # explicit scoped-VMEM limit (fits v7x 64 MiB)


def _round_up(a, b):
    return -(-a // b) * b


def _pick_row_tile(n):
    """Row tile: multiple of 8 (or n itself when n < 8). Prefer >=4, then >=2
    row tiles so the 'parallel' axis can actually shard across TensorCores."""
    if n < 8:
        return n
    for min_tiles in (4, 2):
        for tn in (32, 16, 8):
            if pl.cdiv(n, tn) >= min_tiles:
                return tn
    return 8


def _pick_col_tile(d):
    """Lane tile: multiple of 128 and <= d (or d itself when d < 128),
    balanced so every D-step moves roughly equal bytes."""
    if d < _LANE:
        return d
    kd = pl.cdiv(d, _MAX_TD)
    td = _round_up(pl.cdiv(d, kd), _LANE)
    return min(td, (d // _LANE) * _LANE, _MAX_TD)


# ---- Pallas kernel ---------------------------------------------------------
def _wmse_mae_kernel(x_ref, t_ref, m_ref, mse_ref, mae_ref, *,
                     n_rows, n_cols, mask_rows, mask_cols):
    # Zero the resident accumulators at the first D tile of each row tile.
    @pl.when(pl.program_id(1) == 0)
    def _():
        mse_ref[...] = jnp.zeros_like(mse_ref)
        mae_ref[...] = jnp.zeros_like(mae_ref)

    tn, td = x_ref.shape

    x = x_ref[...].astype(jnp.float32)
    t = t_ref[...].astype(jnp.float32)
    m = m_ref[...].astype(jnp.float32)

    # Balancing weights via a select ladder (thresholds ascending, so the
    # cumulative-delta sum of the original module equals picking the weight of
    # the highest crossed threshold).  Skip entries that don't change the
    # weight (the first HKO threshold maps 1.0 -> 1.0).
    w = jnp.full((tn, td), BALANCING_WEIGHTS[0], dtype=jnp.float32)
    prev = BALANCING_WEIGHTS[0]
    for thr, bw in zip(PIXEL_THRESHOLDS, BALANCING_WEIGHTS[1:]):
        if bw != prev:
            w = jnp.where(t >= jnp.float32(thr), jnp.float32(bw), w)
        prev = bw
    w = w * m

    d = x - t
    a = jnp.abs(d)
    wa = w * a           # shared between MSE and MAE terms: w * |d|
    wse = wa * a         # w * d^2

    # Tail handling without wrapper-side jnp.pad: build a validity mask from
    # iota and SELECT the contributions to zero (stale OOB VMEM data, possibly
    # NaN/Inf, cannot propagate through a select).
    valid = None
    if mask_rows:
        row = pl.program_id(0) * tn + jax.lax.broadcasted_iota(
            jnp.int32, (tn, td), 0)
        valid = row < n_rows
    if mask_cols:
        col = pl.program_id(1) * td + jax.lax.broadcasted_iota(
            jnp.int32, (tn, td), 1)
        cvalid = col < n_cols
        valid = cvalid if valid is None else jnp.logical_and(valid, cvalid)
    if valid is not None:
        zero = jnp.float32(0.0)
        wse = jnp.where(valid, wse, zero)
        wa = jnp.where(valid, wa, zero)

    # Lane reductions on the MXU (dot with a ones vector) to keep the VPU/XLU
    # slots free for the select ladder; HIGHEST precision keeps f32 accuracy.
    ones = jnp.ones((td, 1), dtype=jnp.float32)
    mse_ref[...] += jnp.dot(wse, ones, preferred_element_type=jnp.float32,
                            precision=jax.lax.Precision.HIGHEST)
    mae_ref[...] += jnp.dot(wa, ones, preferred_element_type=jnp.float32,
                            precision=jax.lax.Precision.HIGHEST)


def weighted_mse_mae(inp, target, mask, reg_params=None):
    """Replicates Weighted_mse_mae.forward for (S, B, C, H, W) inputs."""
    S, B, C, H, W = inp.shape
    N = S * B
    D = C * H * W

    # Pure metadata reshapes; no pad / dtype-conversion passes over HBM.
    x = inp.reshape(N, D)
    t = target.reshape(N, D)
    m = mask.reshape(N, D)

    tn = _pick_row_tile(N)
    td = _pick_col_tile(D)
    grid = (pl.cdiv(N, tn), pl.cdiv(D, td))

    kernel = functools.partial(
        _wmse_mae_kernel,
        n_rows=N, n_cols=D,
        mask_rows=(N % tn != 0), mask_cols=(D % td != 0))

    mse_flat, mae_flat = pl.pallas_call(
        kernel,
        out_shape=(
            jax.ShapeDtypeStruct((N, 1), jnp.float32),
            jax.ShapeDtypeStruct((N, 1), jnp.float32),
        ),
        grid_spec=pltpu.PrefetchScalarGridSpec(
            num_scalar_prefetch=0,
            grid=grid,
            in_specs=[
                pl.BlockSpec((tn, td), lambda i, k: (i, k)),
                pl.BlockSpec((tn, td), lambda i, k: (i, k)),
                pl.BlockSpec((tn, td), lambda i, k: (i, k)),
            ],
            out_specs=[
                pl.BlockSpec((tn, 1), lambda i, k: (i, 0)),
                pl.BlockSpec((tn, 1), lambda i, k: (i, 0)),
            ],
        ),
        compiler_params=pltpu.CompilerParams(
            dimension_semantics=("parallel", "arbitrary"),
            vmem_limit_bytes=_VMEM_LIMIT),
    )(x, t, m)

    mse = mse_flat[:, 0].reshape(S, B)
    mae = mae_flat[:, 0].reshape(S, B)

    if LAMBDA is not None:
        # Exact length-S sequence weights (float-step arange can give S+-1).
        w_seq = 1.0 + LAMBDA * jnp.arange(S, dtype=jnp.float32)
        mse = mse * w_seq[:, None]
        mae = mae * w_seq[:, None]

    reg_loss = 0.0
    if reg_params is not None:
        reg_weight = 1e-06
        for params in reg_params:
            p = params.astype(jnp.float32)
            # torch.std uses the unbiased (ddof=1) estimator
            reg_loss = reg_loss + reg_weight * jnp.std(p, ddof=1) / (
                jnp.abs(jnp.mean(p)) + 1e-09)

    train_loss = NORMAL_LOSS_GLOBAL_SCALE * (
        MSE_WEIGHT * jnp.mean(mse) + MAE_WEIGHT * jnp.mean(mae))
    return train_loss + reg_loss


# ---- Pure-JAX reference (for sanity) --------------------------------------
def _reference(inp, target, mask):
    x = inp.astype(jnp.float32)
    t = target.astype(jnp.float32)
    m = mask.astype(jnp.float32)
    w = jnp.full_like(x, BALANCING_WEIGHTS[0])
    for i, thr in enumerate(PIXEL_THRESHOLDS):
        w = w + (BALANCING_WEIGHTS[i + 1] - BALANCING_WEIGHTS[i]) * (
            t >= thr).astype(jnp.float32)
    w = w * m
    mse = jnp.sum(w * (x - t) ** 2, axis=(2, 3, 4))
    mae = jnp.sum(w * jnp.abs(x - t), axis=(2, 3, 4))
    return NORMAL_LOSS_GLOBAL_SCALE * (
        MSE_WEIGHT * jnp.mean(mse) + MAE_WEIGHT * jnp.mean(mae))


def _make_inputs(key, shape):
    k1, k2, k3 = jax.random.split(key, 3)
    inp = jax.random.uniform(k1, shape, dtype=jnp.float32)
    target = jax.random.uniform(k2, shape, dtype=jnp.float32)
    mask = (jax.random.uniform(k3, shape) > 0.1).astype(jnp.float32)
    return inp, target, mask


if __name__ == "__main__":
    key = jax.random.PRNGKey(0)
    k_a, k_b = jax.random.split(key)

    # Aligned case: S=8, B=2, C=1, H=W=16 -> N=16, D=256 (no tail masking).
    inp, target, mask = _make_inputs(k_a, (8, 2, 1, 16, 16))
    loss = jax.block_until_ready(weighted_mse_mae(inp, target, mask))
    ref = jax.block_until_ready(_reference(inp, target, mask))
    assert jnp.allclose(loss, ref, rtol=1e-5, atol=1e-7), (loss, ref)

    # Unaligned case: N=15, D=225 (exercises in-kernel row & column tails).
    inp2, target2, mask2 = _make_inputs(k_b, (5, 3, 1, 15, 15))
    loss2 = jax.block_until_ready(weighted_mse_mae(inp2, target2, mask2))
    ref2 = jax.block_until_ready(_reference(inp2, target2, mask2))
    assert jnp.allclose(loss2, ref2, rtol=1e-5, atol=1e-7), (loss2, ref2)

    print("KERNEL_OK")
</pallas_src>

<mosaic_0001>
module attributes {stable_mosaic.version = 11 : i64} {
  func.func @_wmse_mae_kernel(%arg0: i32, %arg1: i32, %arg2: memref<8x256xf32, #tpu.memory_space<vmem>>, %arg3: memref<8x256xf32, #tpu.memory_space<vmem>>, %arg4: memref<8x256xf32, #tpu.memory_space<vmem>>, %arg5: memref<8x1xf32, #tpu.memory_space<vmem>>, %arg6: memref<8x1xf32, #tpu.memory_space<vmem>>) attributes {dimension_semantics = [#tpu.dimension_semantics<parallel>, #tpu.dimension_semantics<arbitrary>], iteration_bounds = array<i64: 2, 1>, scalar_prefetch = 0 : i64, scratch_operands = 0 : i64, tpu.core_type = #tpu.core_type<tc>, window_params = [{transform_indices = @transform_0, window_bounds = array<i64: 8, 256>}, {transform_indices = @transform_1, window_bounds = array<i64: 8, 256>}, {transform_indices = @transform_2, window_bounds = array<i64: 8, 256>}, {transform_indices = @transform_3, window_bounds = array<i64: 8, 1>}, {transform_indices = @transform_4, window_bounds = array<i64: 8, 1>}]} {
    %c0_i32 = arith.constant 0 : i32
    %0 = arith.cmpi eq, %arg1, %c0_i32 : i32
    %1 = arith.extui %0 : i1 to i32
    %c0_i32_0 = arith.constant 0 : i32
    %2 = arith.cmpi ne, %1, %c0_i32_0 : i32
    scf.if %2 {
      %cst_25 = arith.constant 0.000000e+00 : f32
      %37 = vector.broadcast %cst_25 : f32 to vector<8x1xf32>
      %c0_26 = arith.constant 0 : index
      %c0_27 = arith.constant 0 : index
      %38 = vector.load %arg5[%c0_26, %c0_27] : memref<8x1xf32, #tpu.memory_space<vmem>>, vector<8x1xf32>
      tpu.vector_store %arg5[%c0_26, %c0_27], %37 {strides = array<i32>} : memref<8x1xf32, #tpu.memory_space<vmem>>, vector<8x1xf32>,
      %cst_28 = arith.constant 0.000000e+00 : f32
      %39 = vector.broadcast %cst_28 : f32 to vector<8x1xf32>
      %c0_29 = arith.constant 0 : index
      %c0_30 = arith.constant 0 : index
      %40 = vector.load %arg6[%c0_29, %c0_30] : memref<8x1xf32, #tpu.memory_space<vmem>>, vector<8x1xf32>
      tpu.vector_store %arg6[%c0_29, %c0_30], %39 {strides = array<i32>} : memref<8x1xf32, #tpu.memory_space<vmem>>, vector<8x1xf32>,
    } else {
    }
    %c0 = arith.constant 0 : index
    %c0_1 = arith.constant 0 : index
    %3 = vector.load %arg2[%c0, %c0_1] : memref<8x256xf32, #tpu.memory_space<vmem>>, vector<8x256xf32>
    %c0_2 = arith.constant 0 : index
    %c0_3 = arith.constant 0 : index
    %4 = vector.load %arg3[%c0_2, %c0_3] : memref<8x256xf32, #tpu.memory_space<vmem>>, vector<8x256xf32>
    %c0_4 = arith.constant 0 : index
    %c0_5 = arith.constant 0 : index
    %5 = vector.load %arg4[%c0_4, %c0_5] : memref<8x256xf32, #tpu.memory_space<vmem>>, vector<8x256xf32>
    %cst = arith.constant 1.000000e+00 : f32
    %6 = vector.broadcast %cst : f32 to vector<8x256xf32>
    %cst_6 = arith.constant 0.462426484 : f32
    %7 = vector.broadcast %cst_6 : f32 to vector<8x256xf32>
    %8 = arith.cmpf oge, %4, %7 : vector<8x256xf32>
    %cst_7 = arith.constant 2.000000e+00 : f32
    %9 = vector.broadcast %cst_7 : f32 to vector<8x256xf32>
    %10 = arith.select %8, %9, %6 : vector<8x256xi1>, vector<8x256xf32>
    %cst_8 = arith.constant 0.551110268 : f32
    %11 = vector.broadcast %cst_8 : f32 to vector<8x256xf32>
    %12 = arith.cmpf oge, %4, %11 : vector<8x256xf32>
    %cst_9 = arith.constant 5.000000e+00 : f32
    %13 = vector.broadcast %cst_9 : f32 to vector<8x256xf32>
    %14 = arith.select %12, %13, %10 : vector<8x256xi1>, vector<8x256xf32>
    %cst_10 = arith.constant 0.618196904 : f32
    %15 = vector.broadcast %cst_10 : f32 to vector<8x256xf32>
    %16 = arith.cmpf oge, %4, %15 : vector<8x256xf32>
    %cst_11 = arith.constant 1.000000e+01 : f32
    %17 = vector.broadcast %cst_11 : f32 to vector<8x256xf32>
    %18 = arith.select %16, %17, %14 : vector<8x256xi1>, vector<8x256xf32>
    %cst_12 = arith.constant 0.724526822 : f32
    %19 = vector.broadcast %cst_12 : f32 to vector<8x256xf32>
    %20 = arith.cmpf oge, %4, %19 : vector<8x256xf32>
    %cst_13 = arith.constant 3.000000e+01 : f32
    %21 = vector.broadcast %cst_13 : f32 to vector<8x256xf32>
    %22 = arith.select %20, %21, %18 : vector<8x256xi1>, vector<8x256xf32>
    %23 = arith.mulf %22, %5 : vector<8x256xf32>
    %24 = arith.subf %3, %4 : vector<8x256xf32>
    %25 = math.absf %24 : vector<8x256xf32>
    %26 = arith.mulf %23, %25 : vector<8x256xf32>
    %27 = arith.mulf %26, %25 : vector<8x256xf32>
    %cst_14 = arith.constant 1.000000e+00 : f32
    %28 = vector.broadcast %cst_14 : f32 to vector<256x1xf32>
    %c0_15 = arith.constant 0 : index
    %c0_16 = arith.constant 0 : index
    %29 = vector.load %arg5[%c0_15, %c0_16] : memref<8x1xf32, #tpu.memory_space<vmem>>, vector<8x1xf32>
    %cst_17 = arith.constant dense<0.000000e+00> : vector<8x1xf32>
    %30 = tpu.matmul %27, %28, %cst_17 {dimension_numbers = #tpu.dot_dimension_numbers<[1], [0], [0], [1], [0, 0, 1, 1], [], []>, precision = #tpu.contract_precision<fp32>} : vector<8x256xf32>, vector<256x1xf32>, vector<8x1xf32> -> vector<8x1xf32>
    %31 = arith.addf %29, %30 : vector<8x1xf32>
    %c0_18 = arith.constant 0 : index
    %c0_19 = arith.constant 0 : index
    %32 = vector.load %arg5[%c0_18, %c0_19] : memref<8x1xf32, #tpu.memory_space<vmem>>, vector<8x1xf32>
    tpu.vector_store %arg5[%c0_18, %c0_19], %31 {strides = array<i32>} : memref<8x1xf32, #tpu.memory_space<vmem>>, vector<8x1xf32>,
    %c0_20 = arith.constant 0 : index
    %c0_21 = arith.constant 0 : index
    %33 = vector.load %arg6[%c0_20, %c0_21] : memref<8x1xf32, #tpu.memory_space<vmem>>, vector<8x1xf32>
    %cst_22 = arith.constant dense<0.000000e+00> : vector<8x1xf32>
    %34 = tpu.matmul %26, %28, %cst_22 {dimension_numbers = #tpu.dot_dimension_numbers<[1], [0], [0], [1], [0, 0, 1, 1], [], []>, precision = #tpu.contract_precision<fp32>} : vector<8x256xf32>, vector<256x1xf32>, vector<8x1xf32> -> vector<8x1xf32>
    %35 = arith.addf %33, %34 : vector<8x1xf32>
    %c0_23 = arith.constant 0 : index
    %c0_24 = arith.constant 0 : index
    %36 = vector.load %arg6[%c0_23, %c0_24] : memref<8x1xf32, #tpu.memory_space<vmem>>, vector<8x1xf32>
    tpu.vector_store %arg6[%c0_23, %c0_24], %35 {strides = array<i32>} : memref<8x1xf32, #tpu.memory_space<vmem>>, vector<8x1xf32>,
    return
  }
  func.func @transform_0(%arg0: i32, %arg1: i32) -> (i32, i32) {
    %c0_i32 = arith.constant 0 : i32
    return %arg0, %arg1 : i32, i32
  }
  func.func @transform_1(%arg0: i32, %arg1: i32) -> (i32, i32) {
    %c0_i32 = arith.constant 0 : i32
    return %arg0, %arg1 : i32, i32
  }
  func.func @transform_2(%arg0: i32, %arg1: i32) -> (i32, i32) {
    %c0_i32 = arith.constant 0 : i32
    return %arg0, %arg1 : i32, i32
  }
  func.func @transform_3(%arg0: i32, %arg1: i32) -> (i32, i32) {
    %c0_i32 = arith.constant 0 : i32
    %c0_i32_0 = arith.constant 0 : i32
    return %arg0, %c0_i32 : i32, i32
  }
  func.func @transform_4(%arg0: i32, %arg1: i32) -> (i32, i32) {
    %c0_i32 = arith.constant 0 : i32
    %c0_i32_0 = arith.constant 0 : i32
    return %arg0, %c0_i32 : i32, i32
  }
}

</mosaic_0001>

<bundles_post_ra>
// kernel: tpu_custom_call.1
= control target key start
LH: loop header
LB: loop body
LE: loop exit
PB: predicated region body
PF: predicated region fallthrough
CT: control target
= control target key end

     0   :  { %10 = vsyncpa [#allocation3], 0  ;;  %s2334_s0 = inlined_call_operand.hbm [shape: f32[16,256], index: 0, kind: input, shape index: {}]   ;;  %s2335_s1 = inlined_call_operand.hbm [shape: f32[16,256], index: 1, kind: input, shape index: {}]   ;;  %s2336_s2 = inlined_call_operand.hbm [shape: f32[16,256], index: 2, kind: input, shape index: {}]   ;;  %s2337_s3 = inlined_call_operand.vmem [shape: f32[16,1], index: 3, kind: output, shape index: {0}]   ;;  %s2338_s4 = inlined_call_operand.vmem [shape: f32[16,1], index: 4, kind: output, shape index: {1}]  }
   0x1   :  { %12 = vsyncpa [#allocation3 + $0x1], 0 }
   0x2   :  { %13 = vsyncpa [#allocation5], 0 }
   0x3   :  { %15 = vsyncpa [#allocation5 + $0x1], 0  ;;  %s1994_s15 = smov 0   ;;  %s1996_s16 = smov 0  }
   0x4   :  { %s1998_s17 = smov 0   ;;  %s2000_s18 = smov 0  }
   0x5   :  { %s2002_s19 = smov 0   ;;  %s2004_s20 = smov 0  }
   0x6 LB: > { %s2340_s21 = sadd.s32 4294967295, %s1961_s20   ;;  %s33_s22 = sadd.s32 1, %s1957_s19  ;;  %s1961_s20 = sphi %s2004_s20, %s21_s20   ;;  %s1957_s19 = sphi %s2002_s19, %s2357_s19   ;;  %s1953_s18 = sphi %s2000_s18, %s2356_s18   ;;  %s1949_s17 = sphi %s1998_s17, %s2355_s17   ;;  %s1945_s16 = sphi %s1996_s16, %s2354_s16   ;;  %s1941_s15 = sphi %s1994_s15, %s2353_s15  }
   0x7   : > { %p35_p0 = scmp.ge.s32.totalorder %s33_s22, 2  ;;  %s42_s23 = sadd.s32 1, %s1949_s17 }
   0x8   : > { %p49_p1 = scmp.ne.s32.totalorder %s1949_s17, %s1945_s16  ;;  %p50_p2 = scmp.eq.s32.totalorder %s1961_s20, 0 }
   0x9   : > { %s2359_s22 = smov (%p35_p0, %s33_s22), 0  ;;  %p55_p4 = scmp.ne.s32.totalorder %s1945_s16, %s1941_s15 }
   0xa   : > { %p51_p3 = por %p50_p2, %p49_p1  ;;  %s37_s24 = ssub.s32 %s1957_s19, %s2359_s22 }
   0xb   : > { %p56_p5 = scmp.eq.s32.totalorder %s2340_s21, 0  ;;  %p40_p6 = scmp.eq.s32.totalorder %s37_s24, 0 }
   0xc   : > { %p1765_p8 = scmp.lt.s32.totalorder %s1961_s20, 2  ;;  %s187_s27 = sand.u32 1, %s1949_s17  }
   0xd   : > { %p2035_p7 = por %p56_p5, %p55_p4  ;;  %s2045_s28 = sshll.u32 %s1957_s19, 8 }
   0xe   : > { %s2041_s26 = scalar_select %p40_p6, %s1949_s17, %s42_s23  }
   0xf   : > { %s2343_s25 = scalar_select %p2035_p7, 1, 0 }
  0x10   : > { %s2049_s29 = sshll.u32 %s187_s27, 4  ;;  %p2051_p9 = pnand %p1765_p8, %p51_p3 }
  0x11   : > { %s208_s5 = sand.u32 1, %s1961_s20   ;;  %s2060_s8 = scalar_lea.hbm %s2335_s1, %s2045_s28 }
  0x12   : > { %s2344_s30 = scalar_select %p2051_p9, 1, 0 }
  0x13   : > { %s212_s9 = scalar_lea.vmem [#allocation4], %s2049_s29  ;;  %s2066_s11 = scalar_lea.sflag [#allocation5], %s208_s5 }
  0x14   : > { %s222_s10 = sshll.u32 %s212_s9, 4  ;;  %s1817_s12 = scalar_lea.hbm %s2060_s8, 256  ;;  %s2063_s10 = int_to_ptr.vmem [resolvable:$true] %s222_s10 }
  0x15   : > { %p1818_p11 = scmp.ne.s32.totalorder %s2060_s8, %s1817_s12  ;;  %p2072_p12 = pneg %p2051_p9 }
  0x16   : > { %s1822_s23 = scalar_lea.hbm %s2335_s1, 512  ;;  %p1823_p1 = scmp.lt.u32.totalorder %s2060_s8, %s2335_s1 }
  0x17   : > { %p1820_p13 = pnand %p2072_p12, %p1818_p11  ;;  %p1824_p2 = scmp.lt.u32.totalorder %s1822_s23, %s1817_s12 }
  0x18   : > { %p1826_p4 = scmp.lt.u32.totalorder %s1817_s12, %s2060_s8 }
  0x19   : > { %p1821_p0 = pneg %p1820_p13  ;;  %p1825_p3 = por %p1824_p2, %p1823_p1 }
  0x1b   : > { %p1827_p5 = por %p1826_p4, %p1825_p3 }
  0x1d   : > { %p1828_p6 = pnand %p1827_p5, %p1821_p0 }
  0x1f   : > { %1831 = shalt.err (!%p1828_p6)
}
  0x20   : > { %s1832_s5 = scalar_lea.vmem %s2063_s10, 256  ;;  %s1963_s7 = smov [#allocation4]  }
  0x21   : > { %p1833_p8 = scmp.ne.s32.totalorder %s2063_s10, %s1832_s5  ;;  %s1837_s9 = sshll.u32 %s1963_s7, 4  ;;  %s1838_s9 = int_to_ptr.vmem [resolvable:$false] %s1837_s9 }
  0x22   : > { %s1839_s14 = scalar_lea.vmem %s1838_s9, 512  ;;  %p1840_p10 = scmp.lt.s32.totalorder %s2063_s10, %s1838_s9 }
  0x23   : > { %p1835_p11 = pnand %p1833_p8, %p2072_p12  ;;  %p1841_p7 = scmp.lt.s32.totalorder %s1839_s14, %s1832_s5 }
  0x25   : > { %p1836_p13 = pneg %p1835_p11  ;;  %p1842_p1 = por %p1841_p7, %p1840_p10 }
  0x27   : > { %p1843_p2 = pnand %p1842_p1, %p1836_p13 }
  0x29   : > { %1846 = shalt.err (!%p1843_p2)
}
  0x2a   : > { %1761 = dma.hbm_to_vmem [thread:$0]  (!%p2051_p9), %s2060_s8, 256, %s2063_s10, %s2066_s11  }
  0x2b   : > { %p248_p0 = scmp.lt.s32.totalorder %s1961_s20, 3  ;;  %p2346_p3 = scmp.ge.s32.totalorder %s1961_s20, 1 }
  0x2c   : > { %s2107_s24 = scalar_lea.hbm %s2334_s0, %s2045_s28  ;;  %s191_s6 = scalar_lea.vmem [#allocation2], %s2049_s29 }
  0x2d   : > { %p2099_p4 = pnand %p2346_p3, %p248_p0  ;;  %s201_s5 = sshll.u32 %s191_s6, 4  ;;  %s202_s5 = int_to_ptr.vmem [resolvable:$true] %s201_s5 }
  0x2e   : > { %s188_s8 = scalar_lea.sflag [#allocation3], %s187_s27  ;;  %s1847_s10 = scalar_lea.hbm %s2107_s24, 256 }
  0x2f   : > { %s2347_s12 = scalar_select %p2099_p4, 1, 0 }
  0x30   : > { %p1848_p7 = scmp.ne.s32.totalorder %s2107_s24, %s1847_s10  ;;  %s1852_s14 = scalar_lea.hbm %s2334_s0, 512 }
  0x31   : > { %p1853_p6 = scmp.lt.u32.totalorder %s2107_s24, %s2334_s0  ;;  %p1854_p8 = scmp.lt.u32.totalorder %s1852_s14, %s1847_s10 }
  0x32   : > { %p1850_p10 = pnand %p1848_p7, %p2072_p12  ;;  %p1856_p13 = scmp.lt.u32.totalorder %s1847_s10, %s2107_s24 }
  0x33   : > { %p1855_p11 = por %p1854_p8, %p1853_p6 }
  0x34   : > { %p1851_p5 = pneg %p1850_p10 }
  0x35   : > { %p1857_p1 = por %p1856_p13, %p1855_p11 }
  0x37   : > { %p1858_p2 = pnand %p1857_p1, %p1851_p5 }
  0x39   : > { %1861 = shalt.err (!%p1858_p2)
}
  0x3a   : > { %s1862_s27 = scalar_lea.vmem %s202_s5, 256  ;;  %s1964_s6 = smov [#allocation2]  }
  0x3b   : > { %p1863_p0 = scmp.ne.s32.totalorder %s202_s5, %s1862_s27  ;;  %s1867_s21 = sshll.u32 %s1964_s6, 4  ;;  %s1868_s21 = int_to_ptr.vmem [resolvable:$false] %s1867_s21 }
  0x3c   : > { %s1869_s7 = scalar_lea.vmem %s1868_s21, 512  ;;  %p1870_p10 = scmp.lt.s32.totalorder %s202_s5, %s1868_s21 }
  0x3d   : > { %p1865_p3 = pnand %p1863_p0, %p2072_p12  ;;  %p1871_p4 = scmp.lt.s32.totalorder %s1869_s7, %s1862_s27 }
  0x3f   : > { %p1866_p7 = pneg %p1865_p3  ;;  %p1872_p9 = por %p1871_p4, %p1870_p10 }
  0x41   : > { %p1873_p6 = pnand %p1872_p9, %p1866_p7 }
  0x43   : > { %1876 = shalt.err (!%p1873_p6)
}
  0x44   : > { %p2348_p8 = scmp.ne.s32.totalorder %s2344_s30, 0  ;;  %s2133_s14 = scalar_lea.hbm %s2336_s2, %s2045_s28 }
  0x45   : > { %s233_s21 = scalar_lea.vmem [#allocation6], %s2049_s29  ;;  %s1877_s23 = scalar_lea.hbm %s2133_s14, 256 }
  0x46   : > { %1758 = dma.hbm_to_vmem [thread:$0]  (!%p2348_p8), %s2107_s24, 256, %s202_s5, %s188_s8  }
  0x47   : > { %s243_s15 = sshll.u32 %s233_s21, 4  ;;  %p1878_p9 = scmp.ne.s32.totalorder %s2133_s14, %s1877_s23  ;;  %s244_s15 = int_to_ptr.vmem [resolvable:$true] %s243_s15 }
  0x48   : > { %s1882_s24 = scalar_lea.hbm %s2336_s2, 512  ;;  %p1883_p11 = scmp.lt.u32.totalorder %s2133_s14, %s2336_s2 }
  0x49   : > { %p1880_p4 = pnand %p1878_p9, %p2072_p12  ;;  %p1884_p13 = scmp.lt.u32.totalorder %s1882_s24, %s1877_s23 }
  0x4a   : > { %p1886_p2 = scmp.lt.u32.totalorder %s1877_s23, %s2133_s14 }
  0x4b   : > { %p1881_p5 = pneg %p1880_p4  ;;  %p1885_p1 = por %p1884_p13, %p1883_p11 }
  0x4d   : > { %p1887_p0 = por %p1886_p2, %p1885_p1 }
  0x4f   : > { %p1888_p3 = pnand %p1887_p0, %p1881_p5 }
  0x51   : > { %1891 = shalt.err (!%p1888_p3)
}
  0x52   : > { %s1892_s28 = scalar_lea.vmem %s244_s15, 256  ;;  %s1965_s29 = smov [#allocation6]  }
  0x53   : > { %p1893_p7 = scmp.ne.s32.totalorder %s244_s15, %s1892_s28  ;;  %s1897_s7 = sshll.u32 %s1965_s29, 4  ;;  %s1898_s7 = int_to_ptr.vmem [resolvable:$false] %s1897_s7 }
  0x54   : > { %s1899_s10 = scalar_lea.vmem %s1898_s7, 512  ;;  %p1900_p9 = scmp.lt.s32.totalorder %s244_s15, %s1898_s7 }
  0x55   : > { %p1895_p10 = pnand %p1893_p7, %p2072_p12  ;;  %p1901_p4 = scmp.lt.s32.totalorder %s1899_s10, %s1892_s28 }
  0x57   : > { %p1896_p6 = pneg %p1895_p10  ;;  %p1902_p8 = por %p1901_p4, %p1900_p9 }
  0x59   : > { %p1903_p11 = pnand %p1902_p8, %p1896_p6 }
  0x5b   : > { %1906 = shalt.err (!%p1903_p11)
}
  0x5c   : > { %p2349_p13 = scmp.ne.s32.totalorder %s2344_s30, 0  ;;  %p2350_p5 = scmp.ne.s32.totalorder %s2347_s12, 0 }
  0x5d   : > { %s254_s13 = sand.u32 (!%p2350_p5), 1, %s1945_s16   ;;  %p2351_p12 = scmp.ne.s32.totalorder (!%p2350_p5), %s2343_s25, 0 }
  0x5e   : > { %1764 = dma.hbm_to_vmem [thread:$0]  (!%p2349_p13), %s2133_s14, 256, %s244_s15, %s2066_s11  }
  0x5f   : > { %252 = sbr.rel (%p2350_p5) target bundleno = 450 (0x1c2), region = 32  ;;  %s2157_s9 = sshll.u32 (!%p2350_p5), %s254_s13, 4 }
  0x60   : > { %s255_s21 = scalar_lea.sflag (!%p2350_p5), [#allocation3], %s254_s13  ;;  %s258_s23 = scalar_lea.vmem (!%p2350_p5), [#allocation2], %s2157_s9 }
  0x66   : > { %1932 = dma.done.wait (%p2351_p12), %s255_s21, 256  }
  0x67   : > { %1934 = vsyncadd (%p2351_p12), %s255_s21, 4294967040  ;;  %s2352_s30 = sadd.s32 4294967295, %s1961_s20   ;;  %s267_s14 = scalar_lea.vmem [#allocation4], %s2157_s9 }
  0x68   : > { %s263_s11 = sand.u32 1, %s2352_s30  }
  0x69   : > { %s264_s12 = scalar_lea.sflag [#allocation5], %s263_s11 }
  0x6a   : > { %1936 = dma.done.wait (%p2351_p12), %s264_s12, 512  }
  0x6b   : > { %1938 = vsyncadd (%p2351_p12), %s264_s12, 4294966784  ;;  %v1966_v0 = vmov 1.0|1.0   ;;  %v1967_v1 = vmov 0.0   ;;  %v333_v2 = vld [vmem:[%s258_s23 + $0x8] sm:$0xff]  ;;  %v1968_v5 = vmov 1.0  }
  0x6c   : > { %1653 = vmatprep.subr.bf16.mxu0 %v1966_v0  ;;  %517 = vmatprep.subr.mxu1 %v1967_v1  ;;  %v335_v3 = vld [vmem:[%s267_s14 + $0x8] sm:$0xff]  ;;  %v332_v7 = vld [vmem:[%s258_s23] sm:$0xff]  ;;  %s276_s25 = scalar_lea.vmem [#allocation6], %s2157_s9  ;;  %p317_p8 = scmp.lt.s32.totalorder %s1953_s18, 1  ;;  %vm329_vm8 = vcmask 7168  }
  0x6d   : > { %1654 = vmatpush3.bf16.msra.mxu0 %v1966_v0  ;;  %518 = vmatpush1.msra.mxu1 %v1967_v1  ;;  %vm339_vm0 = vcmp.ge.f32.partialorder %v335_v3, 0.46242648  ;;  %vm343_vm1 = vcmp.ge.f32.partialorder %v335_v3, 0.55111027  ;;  %vm347_vm2 = vcmp.ge.f32.partialorder %v335_v3, 0.6181969  ;;  %v357_v4 = vsub.f32 %v333_v2, %v335_v3 }
  0x6e   : > { %1655 = vmatprep.subr.bf16.mxu0 %v1966_v0  ;;  %1669 = vmatprep.subr.bf16.mxu1 %v1966_v0  ;;  %v341_v6 = vsel %vm339_vm0, 2.0, %v1968_v5  ;;  %vm351_vm3 = vcmp.ge.f32.partialorder %v335_v3, 0.7245268  ;;  %v334_v8 = vld [vmem:[%s267_s14] sm:$0xff]  ;;  %v337_v9 = vld [vmem:[%s276_s25 + $0x8] sm:$0xff]  ;;  %s2361_s18 = smov (!%p317_p8, %s1953_s18), 1 }
  0x6f   : > { %v345_v10 = vsel %vm343_vm1, 5.0, %v341_v6  ;;  %v359_v11 = vand.u32 2147483647, %v357_v4  ;;  %vm338_vm4 = vcmp.ge.f32.partialorder %v334_v8, 0.46242648  ;;  %v356_v12 = vsub.f32 %v332_v7, %v334_v8  ;;  %v336_v16 = vld [vmem:[%s276_s25] sm:$0xff] }
  0x70   : > { %v349_v13 = vsel %vm347_vm2, 10.0, %v345_v10  ;;  %v340_v14 = vsel %vm338_vm4, 2.0, %v1968_v5  ;;  %vm342_vm5 = vcmp.ge.f32.partialorder %v334_v8, 0.55111027  ;;  %vm346_vm6 = vcmp.ge.f32.partialorder %v334_v8, 0.6181969 }
  0x71   : > { %1656 = vmatpush3.bf16.msra.mxu0 %v1966_v0  ;;  %v353_v15 = vsel %vm351_vm3, 30.0, %v349_v13  ;;  %v344_v17 = vsel %vm342_vm5, 5.0, %v340_v14  ;;  %vm350_vm7 = vcmp.ge.f32.partialorder %v334_v8, 0.7245268  ;;  %v358_v20 = vand.u32 2147483647, %v356_v12 }
  0x72   : > { %1657 = vmatprep.subr.bf16.mxu0 %v1966_v0  ;;  %v355_v18 = vmul.f32 %v353_v15, %v337_v9  ;;  %v348_v19 = vsel %vm346_vm6, 10.0, %v344_v17  ;;  %s1436_s15 = sshll.u32 %s2361_s18, 3 }
  0x73   : > { %v352_v21 = vsel %vm350_vm7, 30.0, %v348_v19  ;;  %s320_s24 = scalar_lea.vmem %s2337_s3, %s1436_s15  ;;  %s2307_s28 = scalar_lea.vmem %s2338_s4, %s1436_s15 }
  0x74   : > { %v361_v22 = vmul.f32 %v359_v11, %v355_v18  ;;  %v354_v23 = vmul.f32 %v352_v21, %v336_v16  ;;  %330 = vst.msk [vmem:[%s320_s24] sm:$0xff] %vm329_vm8, %v1967_v1  ;;  %331 = vst.msk [vmem:[%s2307_s28] sm:$0xff] %vm329_vm8, %v1967_v1 }
  0x75   : > { %1658 = vmatpush3.bf16.msra.mxu0 %v1966_v0 }
  0x76   : > { %1659 = vmatprep.subr.bf16.mxu0 %v1966_v0  ;;  %v363_v24 = vmul.f32 %v361_v22, %v359_v11  ;;  %v2184_v25 = vmul.f32 %v358_v20, %v354_v23  ;;  %v2214_v37 = vand.u32 4294901760, %v361_v22 }
  0x78   : > { %v429_v26 = vand.u32 4294901760, %v363_v24  ;;  %v362_v27 = vmul.f32 %v2184_v25, %v358_v20  ;;  %v880_v38 = vsub.f32 %v361_v22, %v2214_v37  ;;  %v885_v42 = vand.u32 4294901760, %v2184_v25 }
  0x79   : > { %1660 = vmatpush3.bf16.msra.mxu0 %v1966_v0 }
  0x7a   : > { %1661 = vmatprep.subr.bf16.mxu0 %v1966_v0  ;;  %v430_v28 = vsub.f32 %v363_v24, %v429_v26  ;;  %v2189_v29 = vand.u32 4294901760, %v362_v27  ;;  %v881_v39 = vand.u32 4294901760, %v880_v38  ;;  %v886_v43 = vsub.f32 %v2184_v25, %v885_v42 }
  0x7b   : > { %v814_v24 = vld [vmem:[%s2307_s28] sm:$0xff] }
  0x7c   : > { %583 = vmatprep.mubr.f32.mxu1 %v430_v28  ;;  %v436_v30 = vsub.f32 %v362_v27, %v2189_v29  ;;  %v431_v31 = vand.u32 4294901760, %v430_v28  ;;  %v882_v40 = vsub.f32 %v880_v38, %v881_v39  ;;  %v887_v44 = vand.u32 4294901760, %v886_v43 }
  0x7d   : > { %1662 = vmatpush3.bf16.msra.mxu0 %v1966_v0 }
  0x7e   : > { %1663 = vmatprep.subr.bf16.mxu0 %v1966_v0  ;;  %586 = vmatmul.mubr.f32.vlgmr.msra.gmra.mrb[0].mxu1 %v436_v30  ;;  %v432_v32 = vsub.f32 %v430_v28, %v431_v31  ;;  %v437_v33 = vand.u32 4294901760, %v436_v30  ;;  %v883_v41 = vand.u32 4294901760, %v882_v40  ;;  %v888_v45 = vsub.f32 %v886_v43, %v887_v44 }
  0x7f   : > { %1670 = vmatpush3.bf16.msra.mxu1 %v1966_v0  ;;  %658 = vmatprep.mubr.f32.mxu1 %v431_v31 }
  0x80   : > { %1671 = vmatprep.subr.bf16.mxu1 %v1966_v0  ;;  %v433_v34 = vand.u32 4294901760, %v432_v32  ;;  %v438_v35 = vsub.f32 %v436_v30, %v437_v33  ;;  %v889_v46 = vand.u32 4294901760, %v888_v45 }
  0x81   : > { %1664 = vmatpush3.bf16.msra.mxu0 %v1966_v0 }
  0x82   : > { %1665 = vmatprep.subr.bf16.mxu0 %v1966_v0  ;;  %434 = vmatprep.mubr.f32.mxu0 %v433_v34  ;;  %v439_v36 = vand.u32 4294901760, %v438_v35 }
  0x83   : > { %1672 = vmatpush3.bf16.msra.mxu1 %v1966_v0 }
  0x84   : > { %1673 = vmatprep.subr.bf16.mxu1 %v1966_v0 }
  0x85   : > { %1666 = vmatpush3.bf16.msra.mxu0 %v1966_v0 }
  0x86   : > { %1667 = vmatprep.subr.bf16.mxu0 %v1966_v0 }
  0x87   : > { %1674 = vmatpush3.bf16.msra.mxu1 %v1966_v0 }
  0x88   : > { %1675 = vmatprep.subr.bf16.mxu1 %v1966_v0 }
  0x89   : > { %1668 = vmatpush3.bf16.msra.mxu0 %v1966_v0 }
  0x8a   : > { %445 = vmatprep.subr.mxu0 %v1967_v1 }
  0x8b   : > { %1676 = vmatpush3.bf16.msra.mxu1 %v1966_v0 }
  0x8c   : > { %440 = vmatmul.mubr.f32.vlgmr.msra.gmra.mrb[0].mxu0 %v439_v36  ;;  %1677 = vmatprep.subr.bf16.mxu1 %v1966_v0 }
  0x8d   : > { %446 = vmatpush1.msra.mxu0 %v1967_v1  ;;  %510 = vmatprep.mubr.f32.mxu0 %v429_v26 }
  0x8e   : > { %667 = vmatprep.subr.mxu0 %v1967_v1 }
  0x8f   : > { %1678 = vmatpush3.bf16.msra.mxu1 %v1966_v0 }
  0x90   : > { %512 = vmatmul.mubr.f32.vlgmr.msra.gmra.mrb[2].mxu0 %v2189_v29  ;;  %1679 = vmatprep.subr.bf16.mxu1 %v1966_v0 }
  0x91   : > { %668 = vmatpush1.msra.mxu0 %v1967_v1  ;;  %732 = vmatprep.mubr.f32.mxu0 %v429_v26 }
  0x92   : > { %1685 = vmatprep.subr.bf16.mxu0 %v1966_v0 }
  0x93   : > { %1680 = vmatpush3.bf16.msra.mxu1 %v1966_v0 }
  0x94   : > { %734 = vmatmul.mubr.f32.vlgmr.msra.gmra.mrb[4].mxu0 %v2189_v29  ;;  %1681 = vmatprep.subr.bf16.mxu1 %v1966_v0 }
  0x95   : > { %1686 = vmatpush3.bf16.msra.mxu0 %v1966_v0  ;;  %804 = vmatprep.mubr.f32.mxu0 %v429_v26 }
  0x96   : > { %1687 = vmatprep.subr.bf16.mxu0 %v1966_v0 }
  0x97   : > { %1682 = vmatpush3.bf16.msra.mxu1 %v1966_v0 }
  0x98   : > { %1683 = vmatprep.subr.bf16.mxu1 %v1966_v0 }
  0x99   : > { %1688 = vmatpush3.bf16.msra.mxu0 %v1966_v0 }
  0x9a   : > { %1689 = vmatprep.subr.bf16.mxu0 %v1966_v0 }
  0x9b   : > { %1684 = vmatpush3.bf16.msra.mxu1 %v1966_v0 }
  0x9c   : > { %1701 = vmatprep.subr.bf16.mxu1 %v1966_v0 }
  0x9d   : > { %1690 = vmatpush3.bf16.msra.mxu0 %v1966_v0 }
  0x9e   : > { %1691 = vmatprep.subr.bf16.mxu0 %v1966_v0  ;;  %662 = vmatmul.mubr.f32.vlgmr.msra.gmra.mrb[2].mxu1 %v437_v33 }
  0x9f   : > { %1702 = vmatpush3.bf16.msra.mxu1 %v1966_v0  ;;  %884 = vmatprep.mubr.f32.mxu1 %v883_v41 }
  0xa0   : > { %1703 = vmatprep.subr.bf16.mxu1 %v1966_v0 }
  0xa1   : > { %1692 = vmatpush3.bf16.msra.mxu0 %v1966_v0 }
  0xa2   : > { %1693 = vmatprep.subr.bf16.mxu0 %v1966_v0 }
  0xa3   : > { %1704 = vmatpush3.bf16.msra.mxu1 %v1966_v0 }
  0xa4   : > { %1705 = vmatprep.subr.bf16.mxu1 %v1966_v0 }
  0xa5   : > { %1694 = vmatpush3.bf16.msra.mxu0 %v1966_v0 }
  0xa6   : > { %1695 = vmatprep.subr.bf16.mxu0 %v1966_v0 }
  0xa7   : > { %1706 = vmatpush3.bf16.msra.mxu1 %v1966_v0 }
  0xa8   : > { %1707 = vmatprep.subr.bf16.mxu1 %v1966_v0 }
  0xa9   : > { %1696 = vmatpush3.bf16.msra.mxu0 %v1966_v0 }
  0xaa   : > { %1697 = vmatprep.subr.bf16.mxu0 %v1966_v0 }
  0xab   : > { %1708 = vmatpush3.bf16.msra.mxu1 %v1966_v0 }
  0xac   : > { %1709 = vmatprep.subr.bf16.mxu1 %v1966_v0 }
  0xad   : > { %1698 = vmatpush3.bf16.msra.mxu0 %v1966_v0 }
  0xae   : > { %1699 = vmatprep.subr.bf16.mxu0 %v1966_v0 }
  0xaf   : > { %1710 = vmatpush3.bf16.msra.mxu1 %v1966_v0 }
  0xb0   : > { %1711 = vmatprep.subr.bf16.mxu1 %v1966_v0 }
  0xb1   : > { %1700 = vmatpush3.bf16.msra.mxu0 %v1966_v0 }
  0xb2   : > { %895 = vmatprep.subr.mxu0 %v1967_v1 }
  0xb3   : > { %1712 = vmatpush3.bf16.msra.mxu1 %v1966_v0 }
  0xb4   : > { %806 = vmatmul.mubr.f32.vlgmr.msra.gmra.mrb[6].mxu0 %v2189_v29  ;;  %1713 = vmatprep.subr.bf16.mxu1 %v1966_v0 }
  0xb5   : > { %896 = vmatpush1.msra.mxu0 %v1967_v1  ;;  %960 = vmatprep.mubr.f32.mxu0 %v2214_v37 }
  0xb6   : > { %1717 = vmatprep.subr.bf16.mxu0 %v1966_v0 }
  0xb7   : > { %1714 = vmatpush3.bf16.msra.mxu1 %v1966_v0 }
  0xb8   : > { %962 = vmatmul.mubr.f32.vlgmr.msra.gmra.mrb[8].mxu0 %v885_v42  ;;  %1715 = vmatprep.subr.bf16.mxu1 %v1966_v0 }
  0xb9   : > { %1718 = vmatpush3.bf16.msra.mxu0 %v1966_v0  ;;  %1108 = vmatprep.mubr.f32.mxu0 %v881_v39 }
  0xba   : > { %1719 = vmatprep.subr.bf16.mxu0 %v1966_v0 }
  0xbb   : > { %1716 = vmatpush3.bf16.msra.mxu1 %v1966_v0 }
  0xbc   : > { %967 = vmatprep.subr.mxu1 %v1967_v1 }
  0xbd   : > { %1720 = vmatpush3.bf16.msra.mxu0 %v1966_v0 }
  0xbe   : > { %1721 = vmatprep.subr.bf16.mxu0 %v1966_v0  ;;  %890 = vmatmul.mubr.f32.vlgmr.msra.gmra.mrb[4].mxu1 %v889_v46 }
  0xbf   : > { %968 = vmatpush1.msra.mxu1 %v1967_v1  ;;  %1033 = vmatprep.mubr.f32.mxu1 %v880_v38 }
  0xc0   : > { %1117 = vmatprep.subr.mxu1 %v1967_v1 }
  0xc1   : > { %1722 = vmatpush3.bf16.msra.mxu0 %v1966_v0 }
  0xc2   : > { %1723 = vmatprep.subr.bf16.mxu0 %v1966_v0  ;;  %1036 = vmatmul.mubr.f32.vlgmr.msra.gmra.mrb[6].mxu1 %v886_v43 }
  0xc3   : > { %1118 = vmatpush1.msra.mxu1 %v1967_v1  ;;  %1182 = vmatprep.mubr.f32.mxu1 %v2214_v37  ;;  %v364_v1 = vld [vmem:[%s320_s24] sm:$0xff] }
  0xc4   : > { %1733 = vmatprep.subr.bf16.mxu1 %v1966_v0 }
  0xc5   : > { %1724 = vmatpush3.bf16.msra.mxu0 %v1966_v0 }
  0xc6   : > { %1725 = vmatprep.subr.bf16.mxu0 %v1966_v0  ;;  %1184 = vmatmul.mubr.f32.vlgmr.msra.gmra.mrb[8].mxu1 %v885_v42 }
  0xc7   : > { %1734 = vmatpush3.bf16.msra.mxu1 %v1966_v0  ;;  %1254 = vmatprep.mubr.f32.mxu1 %v2214_v37 }
  0xc8   : > { %1735 = vmatprep.subr.bf16.mxu1 %v1966_v0 }
  0xc9   : > { %1726 = vmatpush3.bf16.msra.mxu0 %v1966_v0 }
  0xca   : > { %1727 = vmatprep.subr.bf16.mxu0 %v1966_v0 }
  0xcb   : > { %1736 = vmatpush3.bf16.msra.mxu1 %v1966_v0 }
  0xcc   : > { %1737 = vmatprep.subr.bf16.mxu1 %v1966_v0 }
  0xcd   : > { %1728 = vmatpush3.bf16.msra.mxu0 %v1966_v0 }
  0xce   : > { %1729 = vmatprep.subr.bf16.mxu0 %v1966_v0 }
  0xcf   : > { %1738 = vmatpush3.bf16.msra.mxu1 %v1966_v0 }
  0xd0   : > { %1739 = vmatprep.subr.bf16.mxu1 %v1966_v0 }
  0xd1   : > { %1730 = vmatpush3.bf16.msra.mxu0 %v1966_v0 }
  0xd2   : > { %1731 = vmatprep.subr.bf16.mxu0 %v1966_v0 }
  0xd3   : > { %1740 = vmatpush3.bf16.msra.mxu1 %v1966_v0 }
  0xd4   : > { %1741 = vmatprep.subr.bf16.mxu1 %v1966_v0 }
  0xd5   : > { %1732 = vmatpush3.bf16.msra.mxu0 %v1966_v0 }
  0xd7   : > { %1742 = vmatpush3.bf16.msra.mxu1 %v1966_v0 }
  0xd8   : > { %1112 = vmatmul.mubr.f32.vlgmr.msra.gmra.mrb[10].mxu0 %v887_v44  ;;  %1743 = vmatprep.subr.bf16.mxu1 %v1966_v0 }
  0xdb   : > { %1744 = vmatpush3.bf16.msra.mxu1 %v1966_v0 }
  0xdc   : > { %1745 = vmatprep.subr.bf16.mxu1 %v1966_v0 }
  0xdf   : > { %1746 = vmatpush3.bf16.msra.mxu1 %v1966_v0 }
  0xe0   : > { %1747 = vmatprep.subr.bf16.mxu1 %v1966_v0 }
  0xe3   : > { %1748 = vmatpush3.bf16.msra.mxu1 %v1966_v0 }
  0xe6   : > { %1256 = vmatmul.mubr.f32.vlgmr.msra.gmra.mrb[10].mxu1 %v885_v42 }
 0x151   : > { %v587_v47 = vpop.f32.mrb[0].mxu1 }
 0x152   : > { %v589_v48 = vpop.f32.mrb[1].mxu1 }
 0x15f   : > { %v1475_v49 = vpop.f32.mrb[0].mxu0 }
 0x160   : > { %v1476_v50 = vpop.f32.mrb[1].mxu0 }
 0x161   : > { %v1477_v51 = vadd.f32 %v1476_v50, %v1475_v49 }
 0x163   : > { %v513_v52 = vpop.f32.mrb[2].mxu0 }
 0x164   : > { %v514_v53 = vadd.f32 %v1477_v51, %v513_v52  ;;  %v515_v54 = vpop.f32.mrb[3].mxu0 }
 0x166   : > { %v588_v55 = vadd.f32 %v587_v47, %v514_v53 }
 0x167   : > { %v735_v56 = vpop.f32.mrb[4].mxu0 }
 0x168   : > { %v737_v57 = vpop.f32.mrb[5].mxu0 }
 0x171   : > { %v1510_v58 = vpop.f32.mrb[2].mxu1 }
 0x172   : > { %v1511_v59 = vpop.f32.mrb[3].mxu1 }
 0x173   : > { %v1512_v60 = vadd.f32 %v1511_v59, %v1510_v58 }
 0x175   : > { %v664_v61 = vadd.f32 %v1512_v60, %v588_v55 }
 0x177   : > { %v736_v62 = vadd.f32 %v735_v56, %v664_v61 }
 0x187   : > { %v1545_v63 = vpop.f32.mrb[6].mxu0 }
 0x188   : > { %v1546_v0 = vpop.f32.mrb[7].mxu0 }
 0x189   : > { %v1547_v2 = vadd.f32 %v1546_v0, %v1545_v63 }
 0x18b   : > { %v808_v3 = vadd.f32 %v1547_v2, %v736_v62  ;;  %v963_v4 = vpop.f32.mrb[8].mxu0 }
 0x18c   : > { %v965_v5 = vpop.f32.mrb[9].mxu0 }
 0x18d   : > { %v811_v6 = vadd.f32 %v808_v3, %v364_v1 }
 0x18f   : > { %813 = vst.msk [vmem:[%s320_s24] sm:$0xff] %vm329_vm8, %v811_v6 }
 0x191   : > { %v1580_v7 = vpop.f32.mrb[4].mxu1 }
 0x192   : > { %v1581_v8 = vpop.f32.mrb[5].mxu1 }
 0x193   : > { %v1582_v9 = vadd.f32 %v1581_v8, %v1580_v7 }
 0x195   : > { %v964_v10 = vadd.f32 %v1582_v9, %v963_v4  ;;  %v1037_v11 = vpop.f32.mrb[6].mxu1 }
 0x196   : > { %v1039_v12 = vpop.f32.mrb[7].mxu1 }
 0x197   : > { %v1038_v13 = vadd.f32 %v1037_v11, %v964_v10 }
 0x199   : > { %v1185_v14 = vpop.f32.mrb[8].mxu1 }
 0x19a   : > { %v1187_v15 = vpop.f32.mrb[9].mxu1 }
 0x1ab   : > { %v1615_v16 = vpop.f32.mrb[10].mxu0 }
 0x1ac   : > { %v1616_v17 = vpop.f32.mrb[11].mxu0 }
 0x1ad   : > { %v1617_v18 = vadd.f32 %v1616_v17, %v1615_v16 }
 0x1af   : > { %v1114_v19 = vadd.f32 %v1617_v18, %v1038_v13 }
 0x1b1   : > { %v1186_v20 = vadd.f32 %v1185_v14, %v1114_v19 }
 0x1b9   : > { %v1650_v21 = vpop.f32.mrb[10].mxu1 }
 0x1ba   : > { %v1651_v22 = vpop.f32.mrb[11].mxu1 }
 0x1bb   : > { %v1652_v23 = vadd.f32 %v1651_v22, %v1650_v21 }
 0x1bd   : > { %v1258_v25 = vadd.f32 %v1652_v23, %v1186_v20 }
 0x1bf   : > { %v1261_v26 = vadd.f32 %v1258_v25, %v814_v24 }
 0x1c1   : > { %1262 = vst.msk [vmem:[%s2307_s28] sm:$0xff] %vm329_vm8, %v1261_v26 }
 0x1c2 PF: > { %s21_s20 = sadd.s32 1, %s1961_s20   ;;  %s2353_s15 = smov %s1945_s16 }
 0x1c3   : > { %p18_p1 = scmp.ge.s32.totalorder %s21_s20, 4   ;;  %s2354_s16 = smov %s1949_s17 }
 0x1c4   : > { %s2355_s17 = smov %s2041_s26  ;;  %s2356_s18 = smov %s1957_s19 }
 0x1c5   : > { %s2357_s19 = smov %s2359_s22  ;;  %20 = sbr.rel (!%p18_p1) target bundleno = 6 (0x6), region = 112 }
 0x1cc   :  { %1296 = vsyncpa [#allocation3], 1 }
 0x1cd   :  { %1298 = vsyncpa [#allocation3 + $0x1], 1 }
 0x1ce   :  { %1299 = vsyncpa [#allocation5], 1 }
 0x1cf   :  { %1301 = vsyncpa [#allocation5 + $0x1], 1 }

</bundles_post_ra>
